<compile_context>
chip_gen: v6e
topology: v6e:2x2x1
jax: 0.10.0
libtpu: 0.0.40
codegen_flags: <defaults>
</compile_context>

<pallas_src>
import functools

import jax
import jax.numpy as jnp
from jax.experimental import pallas as pl
from jax.experimental.pallas import tpu as pltpu

# ---- module hyper-parameters (OhemCrossEntropy2d defaults, use_weight=True) ----
IGNORE_INDEX = -1
THRESH = 0.7
MIN_KEPT = 100000
AUX = False
AUX_WEIGHT = 0.4
NUM_CLASSES = 19           # implied by the hard-coded 19-class weight vector

CLASS_WEIGHTS = jnp.array(
    [0.8373, 0.918, 0.866, 1.0345, 1.0166, 0.9969, 0.9754, 1.0489, 0.8786,
     1.0023, 0.9539, 0.9843, 1.1116, 0.9037, 1.0865, 1.0955, 1.0865, 1.1529,
     1.0507], dtype=jnp.float32)


# --------------------------- tiling configuration ----------------------------

def _vmem_capacity_bytes():
    try:
        return int(pltpu.get_tpu_info().vmem_capacity_bytes)
    except Exception:
        return 64 * 1024 * 1024   # conservative fallback (v7x-sized VMEM)


def _tile_config():
    vmem = _vmem_capacity_bytes()
    if vmem >= 100 * 1024 * 1024:
        # v5e / v6e: 128 MiB VMEM per core -> big blocks, high scoped limit.
        return {"f32_block_bytes": 8 * 1024 * 1024,
                "vmem_limit": 96 * 1024 * 1024}
    # v7x-class: 64 MiB VMEM per core -> keep blocks and scoped limit modest so
    # the in-kernel f32 (N,C,T) temporaries + double-buffered I/O still fit.
    return {"f32_block_bytes": 3 * 1024 * 1024,
            "vmem_limit": 44 * 1024 * 1024}


def _pick_tile_hw(hw, f32_bytes_per_lane, target_block_bytes, max_lanes=128 * 1024):
    """Largest lane tile (multiple of 128) whose f32 working block stays near
    target_block_bytes.  Sizing by the f32 *working set* (not the HBM dtype)
    keeps the in-kernel upcast temporaries inside the VMEM budget regardless of
    whether the logits arrive as f32 or bf16."""
    t = (target_block_bytes // max(f32_bytes_per_lane, 1)) // 128 * 128
    t = max(128, min(t, max_lanes))
    return hw if hw <= t else t


# --------------------------- Pallas kernels ---------------------------------

def _fused_pixel_kernel(logits_ref, target_ref, weight_ref,
                        mprob_ref, wt_ref,
                        loss_thr_ref, wsum_thr_ref,
                        loss_all_ref, wsum_all_ref,
                        nvalid_ref, nle_ref,
                        *, hw_total, ignore_index, thresh):
    """Single pass over one (N, C, T) logits tile.

    Per-pixel outputs (rare-path consumables):
      mask_prob = softmax(x)[target]   (invalid -> 1.0)
      w_t       = class_weight[target] (invalid -> 0)
    Scalar accumulators (common-path results, resident across the grid):
      loss/weight sums over all valid pixels, over valid pixels with
      mask_prob <= thresh, plus num_valid and n_le(thresh) counts.
    """
    i = pl.program_id(0)

    @pl.when(i == 0)
    def _():
        loss_thr_ref[...] = jnp.zeros_like(loss_thr_ref)
        wsum_thr_ref[...] = jnp.zeros_like(wsum_thr_ref)
        loss_all_ref[...] = jnp.zeros_like(loss_all_ref)
        wsum_all_ref[...] = jnp.zeros_like(wsum_all_ref)
        nvalid_ref[...] = jnp.zeros_like(nvalid_ref)
        nle_ref[...] = jnp.zeros_like(nle_ref)

    x = logits_ref[...].astype(jnp.float32)          # (N, C, T), upcast in-kernel
    t = target_ref[...]                              # (N, T) int32
    w = weight_ref[...]                              # (1, C, 1) f32
    n, c, tl = x.shape

    # Ragged-tail mask for the last block (no padding of the logits in glue).
    pos = i * tl + jax.lax.broadcasted_iota(jnp.int32, (1, tl), 1)   # (1, T)
    inb = pos < hw_total                                             # (1, T)

    valid = jnp.logical_and(t != ignore_index, inb)                  # (N, T)
    tc = jnp.where(valid, t, 0)                                      # (N, T)

    # logsumexp over the class (sublane) axis.
    m = jnp.max(x, axis=1)                                           # (N, T)
    lse = m + jnp.log(jnp.sum(jnp.exp(x - m[:, None, :]), axis=1))   # (N, T)

    # one-hot computed once, reused for both the target logit and the weight.
    cls = jax.lax.broadcasted_iota(jnp.int32, (n, c, tl), 1)         # (N, C, T)
    onehot = cls == tc[:, None, :]                                   # (N, C, T)
    x_t = jnp.sum(jnp.where(onehot, x, 0.0), axis=1)                 # (N, T)
    w_cls = jnp.sum(jnp.where(onehot, w, 0.0), axis=1)               # (N, T)

    # Select-based masking (not multiply) so any garbage in the out-of-bounds
    # tail of a partial block (possibly inf/NaN) never reaches the accumulators.
    wt = jnp.where(valid, w_cls, 0.0)                                # (N, T)
    wnll = jnp.where(valid, w_cls * (lse - x_t), 0.0)                # (N, T)
    mp = jnp.where(valid, jnp.exp(x_t - lse), 1.0)                   # (N, T)

    mprob_ref[...] = mp
    wt_ref[...] = wt

    le = jnp.logical_and(mp <= thresh, inb)                          # (N, T)
    loss_thr_ref[...] += jnp.sum(jnp.where(le, wnll, 0.0), keepdims=True)
    wsum_thr_ref[...] += jnp.sum(jnp.where(le, wt, 0.0), keepdims=True)
    loss_all_ref[...] += jnp.sum(wnll, keepdims=True)
    wsum_all_ref[...] += jnp.sum(wt, keepdims=True)
    nvalid_ref[...] += jnp.sum(valid.astype(jnp.int32), keepdims=True)
    nle_ref[...] += jnp.sum(le.astype(jnp.int32), keepdims=True)


def _ohem_reduce_kernel(mprob_ref, wt_ref, thr_ref, loss_ref, wsum_ref,
                        *, hw_total):
    """Rare-path accumulation of (loss_sum, weight_sum) over kept pixels.

    nll is recomputed as -log(mask_prob) (EUP, free slot in a mem-bound pass);
    the logits are never re-read."""
    @pl.when(pl.program_id(0) == 0)
    def _():
        loss_ref[...] = jnp.zeros_like(loss_ref)
        wsum_ref[...] = jnp.zeros_like(wsum_ref)

    i = pl.program_id(0)
    _, tl = mprob_ref.shape
    pos = i * tl + jax.lax.broadcasted_iota(jnp.int32, (1, tl), 1)   # (1, T)
    inb = pos < hw_total                                             # (1, T)

    mp = mprob_ref[...]
    wt = wt_ref[...]
    keep = jnp.logical_and(mp <= thr_ref[0, 0], inb)                 # (N, T)

    # Clamp avoids -log(0) = inf for probs that underflowed in f32.
    nll = -jnp.log(jnp.maximum(mp, 1e-38))
    loss_ref[...] += jnp.sum(jnp.where(keep, wt * nll, 0.0), keepdims=True)
    wsum_ref[...] += jnp.sum(jnp.where(keep, wt, 0.0), keepdims=True)


# --------------------------- pallas_call wrappers ----------------------------

def _fused_pixel_stats(logits3, target2, class_weight, ignore_index, thresh, cfg):
    n, c, hw = logits3.shape
    tile = _pick_tile_hw(hw, n * c * 4, cfg["f32_block_bytes"])
    grid = (pl.cdiv(hw, tile),)
    w3 = class_weight.reshape(1, c, 1).astype(jnp.float32)

    kernel = functools.partial(_fused_pixel_kernel, hw_total=hw,
                               ignore_index=ignore_index, thresh=float(thresh))
    pix_spec = pl.BlockSpec((n, tile), lambda i: (0, i))
    acc_spec = pl.BlockSpec((1, 1), lambda i: (0, 0))

    f32_scalar = jax.ShapeDtypeStruct((1, 1), jnp.float32)
    i32_scalar = jax.ShapeDtypeStruct((1, 1), jnp.int32)

    return pl.pallas_call(
        kernel,
        out_shape=(jax.ShapeDtypeStruct((n, hw), jnp.float32),   # mask_prob
                   jax.ShapeDtypeStruct((n, hw), jnp.float32),   # w[target]
                   f32_scalar, f32_scalar,                       # loss/wsum @thresh
                   f32_scalar, f32_scalar,                       # loss/wsum all-valid
                   i32_scalar, i32_scalar),                      # num_valid, n_le
        grid_spec=pltpu.PrefetchScalarGridSpec(
            num_scalar_prefetch=0,
            grid=grid,
            in_specs=[pl.BlockSpec((n, c, tile), lambda i: (0, 0, i)),
                      pix_spec,
                      pl.BlockSpec((1, c, 1), lambda i: (0, 0, 0))],
            out_specs=(pix_spec, pix_spec,
                       acc_spec, acc_spec, acc_spec, acc_spec,
                       acc_spec, acc_spec)),
        compiler_params=pltpu.CompilerParams(
            # Resident (1,1) accumulators are revisited each step -> "arbitrary".
            # TODO(synk): on v7x, per-core partial accumulators over a leading
            # size-2 "parallel" axis would keep both TensorCores busy.
            dimension_semantics=("arbitrary",),
            vmem_limit_bytes=cfg["vmem_limit"]),
    )(logits3, target2, w3)


def _ohem_reduce(mprob, wt, thr, cfg):
    n, hw = mprob.shape
    tile = _pick_tile_hw(hw, n * 2 * 4, cfg["f32_block_bytes"])
    grid = (pl.cdiv(hw, tile),)
    thr2 = jnp.reshape(thr.astype(jnp.float32), (1, 1))

    kernel = functools.partial(_ohem_reduce_kernel, hw_total=hw)
    pix_spec = pl.BlockSpec((n, tile), lambda i: (0, i))

    loss_sum, w_sum = pl.pallas_call(
        kernel,
        out_shape=(jax.ShapeDtypeStruct((1, 1), jnp.float32),) * 2,
        grid_spec=pltpu.PrefetchScalarGridSpec(
            num_scalar_prefetch=0,
            grid=grid,
            in_specs=[pix_spec, pix_spec,
                      pl.BlockSpec(memory_space=pltpu.MemorySpace.SMEM)],
            out_specs=(pl.BlockSpec((1, 1), lambda i: (0, 0)),) * 2),
        compiler_params=pltpu.CompilerParams(
            dimension_semantics=("arbitrary",),
            vmem_limit_bytes=cfg["vmem_limit"]),
    )(mprob, wt, thr2)
    return loss_sum[0, 0], w_sum[0, 0]


# --------------------------- OHEM cross entropy -------------------------------

def ohem_cross_entropy_2d(pred_nchw, target_nhw, *, min_kept=MIN_KEPT,
                          thresh=THRESH, ignore_index=IGNORE_INDEX):
    n, c, h, w = pred_nchw.shape
    assert c == CLASS_WEIGHTS.shape[0], "class weights are hard-coded for 19 classes"
    hw = h * w
    cfg = _tile_config()

    # Free views: no transpose copy, no padding; upcast to f32 happens in-kernel.
    logits3 = pred_nchw.reshape(n, c, hw)
    target2 = target_nhw.reshape(n, hw).astype(jnp.int32)

    # Kernel A: one pass over the logits slab, all common-case sums fused in.
    (mprob, wt, loss_thr, wsum_thr, loss_all, wsum_all,
     nvalid, nle) = _fused_pixel_stats(logits3, target2, CLASS_WEIGHTS,
                                       ignore_index, thresh, cfg)
    loss_thr = loss_thr[0, 0]
    wsum_thr = wsum_thr[0, 0]
    loss_all = loss_all[0, 0]
    wsum_all = wsum_all[0, 0]
    num_valid = nvalid[0, 0]
    n_le = nle[0, 0]

    p_total = n * hw
    # PyTorch: mining iff not (min_kept > num_valid) and num_valid > 0.
    do_ohem = jnp.logical_and(num_valid >= min_kept, num_valid > 0)

    if min_kept > 0:
        k = min(p_total, min_kept)                    # static, matches PyTorch
        # If >= k probs are <= thresh, the k-th smallest is <= thresh and the
        # threshold stays at `thresh` -> kernel A's sums are already the answer.
        need_exact = jnp.logical_and(do_ohem, n_le < k)

        def _rare(_):
            # Rare path: k-th smallest prob > thresh; need its exact value.
            # TODO(synk): replace the full sort with a histogram / bisection
            # counting selection over mprob (a few 4 B/px count passes vs a
            # multi-ms XLA sort when this path actually triggers).
            kth = jnp.sort(mprob.reshape(-1))[k - 1]
            return _ohem_reduce(mprob, wt, kth, cfg)

        def _common(_):
            return loss_thr, wsum_thr

        loss_ohem, wsum_ohem = jax.lax.cond(need_exact, _rare, _common, None)
    else:
        loss_ohem, wsum_ohem = loss_thr, wsum_thr

    loss_sum = jnp.where(do_ohem, loss_ohem, loss_all)
    w_sum = jnp.where(do_ohem, wsum_ohem, wsum_all)

    # reduction='mean' with class weights: sum(w_y*nll)/sum(w_y) over kept pixels.
    # Safe denominator so the dead branch never produces 0/0 = NaN (which would
    # poison gradients); PyTorch returns NaN when everything is ignored.
    safe = loss_sum / jnp.maximum(w_sum, jnp.asarray(1e-12, jnp.float32))
    return jnp.where(w_sum > 0, safe, jnp.asarray(0.0, jnp.float32))


def mix_softmax_ce_ohem_loss(preds, target, aux=AUX, aux_weight=AUX_WEIGHT):
    """Mix-style wrapper: main prediction + optional aux heads."""
    if aux:
        loss = ohem_cross_entropy_2d(preds[0], target)
        for p in preds[1:]:
            loss = loss + aux_weight * ohem_cross_entropy_2d(p, target)
        return dict(loss=loss)
    return dict(loss=ohem_cross_entropy_2d(preds[0], target))


# --------------------------- pure-JAX reference (test only) -------------------

def _reference_ohem_ce(pred, target, min_kept=MIN_KEPT, thresh=THRESH,
                       ignore_index=IGNORE_INDEX):
    n, c, h, w = pred.shape
    logits = jnp.transpose(pred, (0, 2, 3, 1)).reshape(-1, c).astype(jnp.float32)
    t = target.reshape(-1).astype(jnp.int32)
    valid = t != ignore_index
    num_valid = int(jnp.sum(valid))
    tc = jnp.where(valid, t, 0)
    prob = jax.nn.softmax(logits, axis=-1)
    mp = jnp.where(valid, jnp.take_along_axis(prob, tc[:, None], axis=1)[:, 0], 1.0)
    p_total = mp.shape[0]
    if min_kept <= num_valid and num_valid > 0:
        threshold = thresh
        if min_kept > 0:
            kth = float(jnp.sort(mp)[min(p_total, min_kept) - 1])
            if kth > thresh:
                threshold = kth
        valid = valid & (mp <= threshold)
    t_fin = jnp.where(valid, t, ignore_index)
    vmask = t_fin != ignore_index
    tcc = jnp.where(vmask, t_fin, 0)
    lse = jax.nn.logsumexp(logits, axis=-1)
    x_t = jnp.take_along_axis(logits, tcc[:, None], axis=1)[:, 0]
    w_t = CLASS_WEIGHTS[tcc] * vmask.astype(jnp.float32)
    return jnp.sum(w_t * (lse - x_t)) / jnp.sum(w_t)


def _close(a, b, tol=1e-4):
    a = float(a)
    b = float(b)
    return abs(a - b) <= tol * max(1.0, abs(b))


# --------------------------------- main --------------------------------------

if __name__ == "__main__":
    key = jax.random.PRNGKey(0)
    k1, k2 = jax.random.split(key)
    n, c, h, w = 2, NUM_CLASSES, 16, 16
    pred = jax.random.normal(k1, (n, c, h, w), dtype=jnp.float32)       # NCHW logits
    target = jax.random.randint(k2, (n, h, w), -1, c)                   # includes ignore_index=-1

    # Default module behavior (min_kept=100000 > num_valid -> no mining, like PyTorch).
    out = mix_softmax_ce_ohem_loss((pred,), target)
    loss = jax.block_until_ready(out["loss"])
    assert loss.shape == () and bool(jnp.isfinite(loss))
    assert _close(loss, _reference_ohem_ce(pred, target))

    # OHEM mining, common path (k-th smallest prob <= thresh -> fused sums used).
    loss_mined = jax.block_until_ready(
        ohem_cross_entropy_2d(pred, target, min_kept=64))
    assert loss_mined.shape == () and bool(jnp.isfinite(loss_mined))
    assert _close(loss_mined, _reference_ohem_ce(pred, target, min_kept=64))

    # OHEM mining, rare path (k-th smallest prob > thresh -> kernel B runs).
    loss_rare = jax.block_until_ready(
        ohem_cross_entropy_2d(pred, target, min_kept=400, thresh=0.001))
    assert loss_rare.shape == () and bool(jnp.isfinite(loss_rare))
    assert _close(loss_rare,
                  _reference_ohem_ce(pred, target, min_kept=400, thresh=0.001),
                  tol=5e-4)

    print("KERNEL_OK")
</pallas_src>

<mosaic_0001>
module attributes {stable_mosaic.version = 11 : i64} {
  func.func @_fused_pixel_kernel(%arg0: i32, %arg1: memref<2x19x256xf32, #tpu.memory_space<vmem>>, %arg2: memref<2x256xi32, #tpu.memory_space<vmem>>, %arg3: memref<1x19x1xf32, #tpu.memory_space<vmem>>, %arg4: memref<2x256xf32, #tpu.memory_space<vmem>>, %arg5: memref<2x256xf32, #tpu.memory_space<vmem>>, %arg6: memref<1x1xf32, #tpu.memory_space<vmem>>, %arg7: memref<1x1xf32, #tpu.memory_space<vmem>>, %arg8: memref<1x1xf32, #tpu.memory_space<vmem>>, %arg9: memref<1x1xf32, #tpu.memory_space<vmem>>, %arg10: memref<1x1xi32, #tpu.memory_space<vmem>>, %arg11: memref<1x1xi32, #tpu.memory_space<vmem>>) attributes {dimension_semantics = [#tpu.dimension_semantics<arbitrary>], iteration_bounds = array<i64: 1>, scalar_prefetch = 0 : i64, scratch_operands = 0 : i64, tpu.core_type = #tpu.core_type<tc>, window_params = [{transform_indices = @transform_0, window_bounds = array<i64: 2, 19, 256>}, {transform_indices = @transform_1, window_bounds = array<i64: 2, 256>}, {pipeline_mode = #tpu.pipeline_mode<synchronous>, transform_indices = @transform_2, window_bounds = array<i64: 1, 19, 1>}, {transform_indices = @transform_3, window_bounds = array<i64: 2, 256>}, {transform_indices = @transform_4, window_bounds = array<i64: 2, 256>}, {pipeline_mode = #tpu.pipeline_mode<synchronous>, transform_indices = @transform_5, window_bounds = array<i64: 1, 1>}, {pipeline_mode = #tpu.pipeline_mode<synchronous>, transform_indices = @transform_6, window_bounds = array<i64: 1, 1>}, {pipeline_mode = #tpu.pipeline_mode<synchronous>, transform_indices = @transform_7, window_bounds = array<i64: 1, 1>}, {pipeline_mode = #tpu.pipeline_mode<synchronous>, transform_indices = @transform_8, window_bounds = array<i64: 1, 1>}, {pipeline_mode = #tpu.pipeline_mode<synchronous>, transform_indices = @transform_9, window_bounds = array<i64: 1, 1>}, {pipeline_mode = #tpu.pipeline_mode<synchronous>, transform_indices = @transform_10, window_bounds = array<i64: 1, 1>}]} {
    %c0_i32 = arith.constant 0 : i32
    %0 = arith.cmpi eq, %arg0, %c0_i32 : i32
    %1 = arith.extui %0 : i1 to i32
    %c0_i32_0 = arith.constant 0 : i32
    %2 = arith.cmpi ne, %1, %c0_i32_0 : i32
    scf.if %2 {
      %cst_55 = arith.constant 0.000000e+00 : f32
      %108 = vector.broadcast %cst_55 : f32 to vector<1x1xf32>
      %c0_56 = arith.constant 0 : index
      %c0_57 = arith.constant 0 : index
      %109 = vector.load %arg6[%c0_56, %c0_57] : memref<1x1xf32, #tpu.memory_space<vmem>>, vector<1x1xf32>
      tpu.vector_store %arg6[%c0_56, %c0_57], %108 {strides = array<i32>} : memref<1x1xf32, #tpu.memory_space<vmem>>, vector<1x1xf32>,
      %cst_58 = arith.constant 0.000000e+00 : f32
      %110 = vector.broadcast %cst_58 : f32 to vector<1x1xf32>
      %c0_59 = arith.constant 0 : index
      %c0_60 = arith.constant 0 : index
      %111 = vector.load %arg7[%c0_59, %c0_60] : memref<1x1xf32, #tpu.memory_space<vmem>>, vector<1x1xf32>
      tpu.vector_store %arg7[%c0_59, %c0_60], %110 {strides = array<i32>} : memref<1x1xf32, #tpu.memory_space<vmem>>, vector<1x1xf32>,
      %cst_61 = arith.constant 0.000000e+00 : f32
      %112 = vector.broadcast %cst_61 : f32 to vector<1x1xf32>
      %c0_62 = arith.constant 0 : index
      %c0_63 = arith.constant 0 : index
      %113 = vector.load %arg8[%c0_62, %c0_63] : memref<1x1xf32, #tpu.memory_space<vmem>>, vector<1x1xf32>
      tpu.vector_store %arg8[%c0_62, %c0_63], %112 {strides = array<i32>} : memref<1x1xf32, #tpu.memory_space<vmem>>, vector<1x1xf32>,
      %cst_64 = arith.constant 0.000000e+00 : f32
      %114 = vector.broadcast %cst_64 : f32 to vector<1x1xf32>
      %c0_65 = arith.constant 0 : index
      %c0_66 = arith.constant 0 : index
      %115 = vector.load %arg9[%c0_65, %c0_66] : memref<1x1xf32, #tpu.memory_space<vmem>>, vector<1x1xf32>
      tpu.vector_store %arg9[%c0_65, %c0_66], %114 {strides = array<i32>} : memref<1x1xf32, #tpu.memory_space<vmem>>, vector<1x1xf32>,
      %c0_i32_67 = arith.constant 0 : i32
      %116 = vector.broadcast %c0_i32_67 : i32 to vector<1x1xi32>
      %c0_68 = arith.constant 0 : index
      %c0_69 = arith.constant 0 : index
      %117 = vector.load %arg10[%c0_68, %c0_69] : memref<1x1xi32, #tpu.memory_space<vmem>>, vector<1x1xi32>
      tpu.vector_store %arg10[%c0_68, %c0_69], %116 {strides = array<i32>} : memref<1x1xi32, #tpu.memory_space<vmem>>, vector<1x1xi32>,
      %c0_i32_70 = arith.constant 0 : i32
      %118 = vector.broadcast %c0_i32_70 : i32 to vector<1x1xi32>
      %c0_71 = arith.constant 0 : index
      %c0_72 = arith.constant 0 : index
      %119 = vector.load %arg11[%c0_71, %c0_72] : memref<1x1xi32, #tpu.memory_space<vmem>>, vector<1x1xi32>
      tpu.vector_store %arg11[%c0_71, %c0_72], %118 {strides = array<i32>} : memref<1x1xi32, #tpu.memory_space<vmem>>, vector<1x1xi32>,
    } else {
    }
    %c0 = arith.constant 0 : index
    %c0_1 = arith.constant 0 : index
    %c0_2 = arith.constant 0 : index
    %3 = vector.load %arg1[%c0, %c0_1, %c0_2] : memref<2x19x256xf32, #tpu.memory_space<vmem>>, vector<2x19x256xf32>
    %c0_3 = arith.constant 0 : index
    %c0_4 = arith.constant 0 : index
    %4 = vector.load %arg2[%c0_3, %c0_4] : memref<2x256xi32, #tpu.memory_space<vmem>>, vector<2x256xi32>
    %c0_5 = arith.constant 0 : index
    %c0_6 = arith.constant 0 : index
    %c0_7 = arith.constant 0 : index
    %5 = vector.load %arg3[%c0_5, %c0_6, %c0_7] : memref<1x19x1xf32, #tpu.memory_space<vmem>>, vector<1x19x1xf32>
    %c256_i32 = arith.constant 256 : i32
    %6 = arith.muli %arg0, %c256_i32 : i32
    %7 = tpu.iota {dimensions = array<i32: 1>} : vector<1x256xi32>
    %8 = vector.broadcast %6 : i32 to vector<1x256xi32>
    %9 = arith.addi %8, %7 : vector<1x256xi32>
    %c256_i32_8 = arith.constant 256 : i32
    %10 = vector.broadcast %c256_i32_8 : i32 to vector<1x256xi32>
    %11 = arith.cmpi slt, %9, %10 : vector<1x256xi32>
    %c-1_i32 = arith.constant -1 : i32
    %12 = vector.broadcast %c-1_i32 : i32 to vector<2x256xi32>
    %13 = arith.cmpi ne, %4, %12 : vector<2x256xi32>
    %14 = vector.broadcast %11 : vector<1x256xi1> to vector<2x256xi1>
    %15 = arith.andi %13, %14 : vector<2x256xi1>
    %c0_i32_9 = arith.constant 0 : i32
    %16 = vector.broadcast %c0_i32_9 : i32 to vector<2x256xi32>
    %17 = arith.select %15, %4, %16 : vector<2x256xi1>, vector<2x256xi32>
    %cst = arith.constant dense<0xFF800000> : vector<2x256xf32>
    %18 = vector.multi_reduction <maximumf>, %3, %cst [1] : vector<2x19x256xf32> to vector<2x256xf32>
    %19 = vector.shape_cast %18 : vector<2x256xf32> to vector<2x1x256xf32>
    %20 = vector.broadcast %19 : vector<2x1x256xf32> to vector<2x19x256xf32>
    %21 = arith.subf %3, %20 : vector<2x19x256xf32>
    %22 = math.exp %21 : vector<2x19x256xf32>
    %cst_10 = arith.constant dense<0.000000e+00> : vector<2x256xf32>
    %23 = vector.multi_reduction <add>, %22, %cst_10 [1] : vector<2x19x256xf32> to vector<2x256xf32>
    %24 = math.log %23 : vector<2x256xf32>
    %25 = arith.addf %18, %24 : vector<2x256xf32>
    %26 = tpu.iota {dimensions = array<i32: 1>} : vector<2x19x256xi32>
    %27 = vector.shape_cast %17 : vector<2x256xi32> to vector<2x1x256xi32>
    %28 = vector.broadcast %27 : vector<2x1x256xi32> to vector<2x19x256xi32>
    %29 = arith.cmpi eq, %26, %28 : vector<2x19x256xi32>
    %cst_11 = arith.constant 0.000000e+00 : f32
    %30 = vector.broadcast %cst_11 : f32 to vector<2x19x256xf32>
    %31 = arith.select %29, %3, %30 : vector<2x19x256xi1>, vector<2x19x256xf32>
    %cst_12 = arith.constant dense<0.000000e+00> : vector<2x256xf32>
    %32 = vector.multi_reduction <add>, %31, %cst_12 [1] : vector<2x19x256xf32> to vector<2x256xf32>
    %cst_13 = arith.constant 0.000000e+00 : f32
    %33 = vector.shape_cast %5 : vector<1x19x1xf32> to vector<1x19x1xf32>
    %34 = vector.broadcast %33 : vector<1x19x1xf32> to vector<2x19x256xf32>
    %35 = vector.broadcast %cst_13 : f32 to vector<2x19x256xf32>
    %36 = arith.select %29, %34, %35 : vector<2x19x256xi1>, vector<2x19x256xf32>
    %cst_14 = arith.constant dense<0.000000e+00> : vector<2x256xf32>
    %37 = vector.multi_reduction <add>, %36, %cst_14 [1] : vector<2x19x256xf32> to vector<2x256xf32>
    %cst_15 = arith.constant 0.000000e+00 : f32
    %38 = vector.broadcast %cst_15 : f32 to vector<2x256xf32>
    %39 = arith.select %15, %37, %38 : vector<2x256xi1>, vector<2x256xf32>
    %40 = arith.subf %25, %32 : vector<2x256xf32>
    %41 = arith.mulf %37, %40 : vector<2x256xf32>
    %cst_16 = arith.constant 0.000000e+00 : f32
    %42 = vector.broadcast %cst_16 : f32 to vector<2x256xf32>
    %43 = arith.select %15, %41, %42 : vector<2x256xi1>, vector<2x256xf32>
    %44 = arith.subf %32, %25 : vector<2x256xf32>
    %45 = math.exp %44 : vector<2x256xf32>
    %cst_17 = arith.constant 1.000000e+00 : f32
    %46 = vector.broadcast %cst_17 : f32 to vector<2x256xf32>
    %47 = arith.select %15, %45, %46 : vector<2x256xi1>, vector<2x256xf32>
    %c0_18 = arith.constant 0 : index
    %c0_19 = arith.constant 0 : index
    %48 = vector.load %arg4[%c0_18, %c0_19] : memref<2x256xf32, #tpu.memory_space<vmem>>, vector<2x256xf32>
    tpu.vector_store %arg4[%c0_18, %c0_19], %47 {strides = array<i32>} : memref<2x256xf32, #tpu.memory_space<vmem>>, vector<2x256xf32>,
    %c0_20 = arith.constant 0 : index
    %c0_21 = arith.constant 0 : index
    %49 = vector.load %arg5[%c0_20, %c0_21] : memref<2x256xf32, #tpu.memory_space<vmem>>, vector<2x256xf32>
    tpu.vector_store %arg5[%c0_20, %c0_21], %39 {strides = array<i32>} : memref<2x256xf32, #tpu.memory_space<vmem>>, vector<2x256xf32>,
    %cst_22 = arith.constant 0.699999988 : f32
    %50 = vector.broadcast %cst_22 : f32 to vector<2x256xf32>
    %51 = arith.cmpf ole, %47, %50 : vector<2x256xf32>
    %52 = vector.broadcast %11 : vector<1x256xi1> to vector<2x256xi1>
    %53 = arith.andi %51, %52 : vector<2x256xi1>
    %c0_23 = arith.constant 0 : index
    %c0_24 = arith.constant 0 : index
    %54 = vector.load %arg6[%c0_23, %c0_24] : memref<1x1xf32, #tpu.memory_space<vmem>>, vector<1x1xf32>
    %cst_25 = arith.constant 0.000000e+00 : f32
    %55 = vector.broadcast %cst_25 : f32 to vector<2x256xf32>
    %56 = arith.select %53, %43, %55 : vector<2x256xi1>, vector<2x256xf32>
    %57 = vector.shape_cast %56 : vector<2x256xf32> to vector<1x2x256xf32>
    %cst_26 = arith.constant dense<0.000000e+00> : vector<1xf32>
    %58 = vector.multi_reduction <add>, %57, %cst_26 [1, 2] : vector<1x2x256xf32> to vector<1xf32>
    %59 = vector.shape_cast %58 : vector<1xf32> to vector<1x1x1xf32>
    %60 = vector.extract %59[0, 0, 0] : f32 from vector<1x1x1xf32>
    %61 = vector.broadcast %60 : f32 to vector<1x1xf32>
    %62 = arith.addf %54, %61 : vector<1x1xf32>
    %c0_27 = arith.constant 0 : index
    %c0_28 = arith.constant 0 : index
    %63 = vector.load %arg6[%c0_27, %c0_28] : memref<1x1xf32, #tpu.memory_space<vmem>>, vector<1x1xf32>
    tpu.vector_store %arg6[%c0_27, %c0_28], %62 {strides = array<i32>} : memref<1x1xf32, #tpu.memory_space<vmem>>, vector<1x1xf32>,
    %c0_29 = arith.constant 0 : index
    %c0_30 = arith.constant 0 : index
    %64 = vector.load %arg7[%c0_29, %c0_30] : memref<1x1xf32, #tpu.memory_space<vmem>>, vector<1x1xf32>
    %cst_31 = arith.constant 0.000000e+00 : f32
    %65 = vector.broadcast %cst_31 : f32 to vector<2x256xf32>
    %66 = arith.select %53, %39, %65 : vector<2x256xi1>, vector<2x256xf32>
    %67 = vector.shape_cast %66 : vector<2x256xf32> to vector<1x2x256xf32>
    %cst_32 = arith.constant dense<0.000000e+00> : vector<1xf32>
    %68 = vector.multi_reduction <add>, %67, %cst_32 [1, 2] : vector<1x2x256xf32> to vector<1xf32>
    %69 = vector.shape_cast %68 : vector<1xf32> to vector<1x1x1xf32>
    %70 = vector.extract %69[0, 0, 0] : f32 from vector<1x1x1xf32>
    %71 = vector.broadcast %70 : f32 to vector<1x1xf32>
    %72 = arith.addf %64, %71 : vector<1x1xf32>
    %c0_33 = arith.constant 0 : index
    %c0_34 = arith.constant 0 : index
    %73 = vector.load %arg7[%c0_33, %c0_34] : memref<1x1xf32, #tpu.memory_space<vmem>>, vector<1x1xf32>
    tpu.vector_store %arg7[%c0_33, %c0_34], %72 {strides = array<i32>} : memref<1x1xf32, #tpu.memory_space<vmem>>, vector<1x1xf32>,
    %c0_35 = arith.constant 0 : index
    %c0_36 = arith.constant 0 : index
    %74 = vector.load %arg8[%c0_35, %c0_36] : memref<1x1xf32, #tpu.memory_space<vmem>>, vector<1x1xf32>
    %75 = vector.shape_cast %43 : vector<2x256xf32> to vector<1x2x256xf32>
    %cst_37 = arith.constant dense<0.000000e+00> : vector<1xf32>
    %76 = vector.multi_reduction <add>, %75, %cst_37 [1, 2] : vector<1x2x256xf32> to vector<1xf32>
    %77 = vector.shape_cast %76 : vector<1xf32> to vector<1x1x1xf32>
    %78 = vector.extract %77[0, 0, 0] : f32 from vector<1x1x1xf32>
    %79 = vector.broadcast %78 : f32 to vector<1x1xf32>
    %80 = arith.addf %74, %79 : vector<1x1xf32>
    %c0_38 = arith.constant 0 : index
    %c0_39 = arith.constant 0 : index
    %81 = vector.load %arg8[%c0_38, %c0_39] : memref<1x1xf32, #tpu.memory_space<vmem>>, vector<1x1xf32>
    tpu.vector_store %arg8[%c0_38, %c0_39], %80 {strides = array<i32>} : memref<1x1xf32, #tpu.memory_space<vmem>>, vector<1x1xf32>,
    %c0_40 = arith.constant 0 : index
    %c0_41 = arith.constant 0 : index
    %82 = vector.load %arg9[%c0_40, %c0_41] : memref<1x1xf32, #tpu.memory_space<vmem>>, vector<1x1xf32>
    %83 = vector.shape_cast %39 : vector<2x256xf32> to vector<1x2x256xf32>
    %cst_42 = arith.constant dense<0.000000e+00> : vector<1xf32>
    %84 = vector.multi_reduction <add>, %83, %cst_42 [1, 2] : vector<1x2x256xf32> to vector<1xf32>
    %85 = vector.shape_cast %84 : vector<1xf32> to vector<1x1x1xf32>
    %86 = vector.extract %85[0, 0, 0] : f32 from vector<1x1x1xf32>
    %87 = vector.broadcast %86 : f32 to vector<1x1xf32>
    %88 = arith.addf %82, %87 : vector<1x1xf32>
    %c0_43 = arith.constant 0 : index
    %c0_44 = arith.constant 0 : index
    %89 = vector.load %arg9[%c0_43, %c0_44] : memref<1x1xf32, #tpu.memory_space<vmem>>, vector<1x1xf32>
    tpu.vector_store %arg9[%c0_43, %c0_44], %88 {strides = array<i32>} : memref<1x1xf32, #tpu.memory_space<vmem>>, vector<1x1xf32>,
    %c0_45 = arith.constant 0 : index
    %c0_46 = arith.constant 0 : index
    %90 = vector.load %arg10[%c0_45, %c0_46] : memref<1x1xi32, #tpu.memory_space<vmem>>, vector<1x1xi32>
    %91 = arith.extui %15 : vector<2x256xi1> to vector<2x256xi32>
    %92 = vector.shape_cast %91 : vector<2x256xi32> to vector<1x2x256xi32>
    %cst_47 = arith.constant dense<0> : vector<1xi32>
    %93 = vector.multi_reduction <add>, %92, %cst_47 [1, 2] : vector<1x2x256xi32> to vector<1xi32>
    %94 = vector.shape_cast %93 : vector<1xi32> to vector<1x1x1xi32>
    %95 = vector.extract %94[0, 0, 0] : i32 from vector<1x1x1xi32>
    %96 = vector.broadcast %95 : i32 to vector<1x1xi32>
    %97 = arith.addi %90, %96 : vector<1x1xi32>
    %c0_48 = arith.constant 0 : index
    %c0_49 = arith.constant 0 : index
    %98 = vector.load %arg10[%c0_48, %c0_49] : memref<1x1xi32, #tpu.memory_space<vmem>>, vector<1x1xi32>
    tpu.vector_store %arg10[%c0_48, %c0_49], %97 {strides = array<i32>} : memref<1x1xi32, #tpu.memory_space<vmem>>, vector<1x1xi32>,
    %c0_50 = arith.constant 0 : index
    %c0_51 = arith.constant 0 : index
    %99 = vector.load %arg11[%c0_50, %c0_51] : memref<1x1xi32, #tpu.memory_space<vmem>>, vector<1x1xi32>
    %100 = arith.extui %53 : vector<2x256xi1> to vector<2x256xi32>
    %101 = vector.shape_cast %100 : vector<2x256xi32> to vector<1x2x256xi32>
    %cst_52 = arith.constant dense<0> : vector<1xi32>
    %102 = vector.multi_reduction <add>, %101, %cst_52 [1, 2] : vector<1x2x256xi32> to vector<1xi32>
    %103 = vector.shape_cast %102 : vector<1xi32> to vector<1x1x1xi32>
    %104 = vector.extract %103[0, 0, 0] : i32 from vector<1x1x1xi32>
    %105 = vector.broadcast %104 : i32 to vector<1x1xi32>
    %106 = arith.addi %99, %105 : vector<1x1xi32>
    %c0_53 = arith.constant 0 : index
    %c0_54 = arith.constant 0 : index
    %107 = vector.load %arg11[%c0_53, %c0_54] : memref<1x1xi32, #tpu.memory_space<vmem>>, vector<1x1xi32>
    tpu.vector_store %arg11[%c0_53, %c0_54], %106 {strides = array<i32>} : memref<1x1xi32, #tpu.memory_space<vmem>>, vector<1x1xi32>,
    return
  }
  func.func @transform_0(%arg0: i32) -> (i32, i32, i32) {
    %c0_i32 = arith.constant 0 : i32
    %c0_i32_0 = arith.constant 0 : i32
    %c0_i32_1 = arith.constant 0 : i32
    return %c0_i32, %c0_i32_0, %arg0 : i32, i32, i32
  }
  func.func @transform_1(%arg0: i32) -> (i32, i32) {
    %c0_i32 = arith.constant 0 : i32
    %c0_i32_0 = arith.constant 0 : i32
    return %c0_i32, %arg0 : i32, i32
  }
  func.func @transform_2(%arg0: i32) -> (i32, i32, i32) {
    %c0_i32 = arith.constant 0 : i32
    %c0_i32_0 = arith.constant 0 : i32
    %c0_i32_1 = arith.constant 0 : i32
    %c0_i32_2 = arith.constant 0 : i32
    return %c0_i32, %c0_i32_0, %c0_i32_1 : i32, i32, i32
  }
  func.func @transform_3(%arg0: i32) -> (i32, i32) {
    %c0_i32 = arith.constant 0 : i32
    %c0_i32_0 = arith.constant 0 : i32
    return %c0_i32, %arg0 : i32, i32
  }
  func.func @transform_4(%arg0: i32) -> (i32, i32) {
    %c0_i32 = arith.constant 0 : i32
    %c0_i32_0 = arith.constant 0 : i32
    return %c0_i32, %arg0 : i32, i32
  }
  func.func @transform_5(%arg0: i32) -> (i32, i32) {
    %c0_i32 = arith.constant 0 : i32
    %c0_i32_0 = arith.constant 0 : i32
    %c0_i32_1 = arith.constant 0 : i32
    return %c0_i32, %c0_i32_0 : i32, i32
  }
  func.func @transform_6(%arg0: i32) -> (i32, i32) {
    %c0_i32 = arith.constant 0 : i32
    %c0_i32_0 = arith.constant 0 : i32
    %c0_i32_1 = arith.constant 0 : i32
    return %c0_i32, %c0_i32_0 : i32, i32
  }
  func.func @transform_7(%arg0: i32) -> (i32, i32) {
    %c0_i32 = arith.constant 0 : i32
    %c0_i32_0 = arith.constant 0 : i32
    %c0_i32_1 = arith.constant 0 : i32
    return %c0_i32, %c0_i32_0 : i32, i32
  }
  func.func @transform_8(%arg0: i32) -> (i32, i32) {
    %c0_i32 = arith.constant 0 : i32
    %c0_i32_0 = arith.constant 0 : i32
    %c0_i32_1 = arith.constant 0 : i32
    return %c0_i32, %c0_i32_0 : i32, i32
  }
  func.func @transform_9(%arg0: i32) -> (i32, i32) {
    %c0_i32 = arith.constant 0 : i32
    %c0_i32_0 = arith.constant 0 : i32
    %c0_i32_1 = arith.constant 0 : i32
    return %c0_i32, %c0_i32_0 : i32, i32
  }
  func.func @transform_10(%arg0: i32) -> (i32, i32) {
    %c0_i32 = arith.constant 0 : i32
    %c0_i32_0 = arith.constant 0 : i32
    %c0_i32_1 = arith.constant 0 : i32
    return %c0_i32, %c0_i32_0 : i32, i32
  }
}

</mosaic_0001>

<bundles_post_ra>
// kernel: tpu_custom_call.1
= control target key start
LH: loop header
LB: loop body
LE: loop exit
PB: predicated region body
PF: predicated region fallthrough
CT: control target
= control target key end

     0   :  { %16 = vsyncpa [#allocation3], 0  ;;  %s1523_s0 = inlined_call_operand.vmem [shape: f32[2,19,256], index: 0, kind: input, shape index: {}]   ;;  %s1524_s1 = inlined_call_operand.vmem [shape: s32[2,256], index: 1, kind: input, shape index: {}]   ;;  %s1525_s2 = inlined_call_operand.vmem [shape: f32[1,19,1], index: 2, kind: input, shape index: {}]   ;;  %s1526_s3 = inlined_call_operand.hbm [shape: f32[2,256], index: 3, kind: output, shape index: {0}]   ;;  %s1527_s4 = inlined_call_operand.hbm [shape: f32[2,256], index: 4, kind: output, shape index: {1}]   ;;  %s1528_s5 = inlined_call_operand.hbm [shape: f32[1,1], index: 5, kind: output, shape index: {2}]   ;;  %s1529_s6 = inlined_call_operand.hbm [shape: f32[1,1], index: 6, kind: output, shape index: {3}]   ;;  %s1530_s7 = inlined_call_operand.hbm [shape: f32[1,1], index: 7, kind: output, shape index: {4}]   ;;  %s1531_s8 = inlined_call_operand.hbm [shape: f32[1,1], index: 8, kind: output, shape index: {5}]   ;;  %s1532_s9 = inlined_call_operand.hbm [shape: s32[1,1], index: 9, kind: output, shape index: {6}]   ;;  %s1533_s10 = inlined_call_operand.hbm [shape: s32[1,1], index: 10, kind: output, shape index: {7}]  }
   0x1   :  { %17 = vsyncpa [#allocation5], 0 }
   0x2   :  { %18 = vsyncpa [#allocation8], 0 }
   0x3   :  { %19 = vsyncpa [#allocation11], 0  ;;  %v51_v0 = vld [vmem:[%s1525_s2] sm:$0xff]  ;;  %v53_v1 = vld [vmem:[%s1525_s2 + $0x10] sm:$0x7]  ;;  %v998_v2 = vmov 0  }
   0x4   :  { %786 = vset.pattern.permute.xlu0 %v998_v2  ;;  %787 = vset.pattern.permute.xlu1 %v998_v2  ;;  %v52_v3 = vld [vmem:[%s1525_s2 + $0x8] sm:$0xff]  ;;  %v1080_v4 = vld [vmem:[%s1523_s0] sm:$0xff]  ;;  %v1090_v6 = vld [vmem:[%s1523_s0 + $0x30] sm:$0xff]  ;;  %vm1538_vm0 = vcmask 1042432  }
   0x5   :  { %292 = vperm.xlu0 %786, %v51_v0   ;;  %302 = vperm.xlu1 %787, %v53_v1   ;;  %v1085_v5 = vld [vmem:[%s1523_s0 + $0x8] sm:$0xff]  ;;  %v1095_v7 = vld [vmem:[%s1523_s0 + $0x38] sm:$0xff]  ;;  %v1100_v8 = vld [vmem:[%s1523_s0 + $0x10] sm:$0xff] }
   0x6   :  { %v1105_v9 = vld [vmem:[%s1523_s0 + $0x18] sm:$0xff]  ;;  %v1110_v10 = vld [vmem:[%s1523_s0 + $0x40] sm:$0xff]  ;;  %v1115_v11 = vld [vmem:[%s1523_s0 + $0x48] sm:$0xff]  ;;  %v81_v12 = vmax.f32 %v1080_v4, %v1100_v8 }
   0x7   :  { %v1122_v13 = vld [vmem:[%s1523_s0 + $0x20] sm:$0x7]  ;;  %v91_v14 = vmax.f32 %v1085_v5, %v1105_v9  ;;  %v100_v15 = vmax.f32 %v1090_v6, %v1110_v10  ;;  %v109_v16 = vmax.f32 %v1095_v7, %v1115_v11  ;;  %v1133_v17 = vld [vmem:[%s1523_s0 + $0x28] sm:$0x7]  ;;  %v1138_v18 = vld [vmem:[%s1523_s0 + $0x50] sm:$0x7] }
   0x8   :  { %v1143_v19 = vld [vmem:[%s1523_s0 + $0x58] sm:$0x7]  ;;  %v83_v20 = vsel %vm1538_vm0, %v1122_v13, -inf  ;;  %v92_v21 = vsel %vm1538_vm0, %v1133_v17, -inf }
   0x9   :  { %297 = vperm.xlu0 %786, %v52_v3  }
   0xa   :  { %20 = vsyncpa [#allocation14], 0  ;;  %v84_v22 = vmax.f32 %v81_v12, %v83_v20  ;;  %v93_v23 = vmax.f32 %v91_v14, %v92_v21  ;;  %v101_v24 = vsel %vm1538_vm0, %v1138_v18, -inf  ;;  %v74_v25 = vlaneseq  ;;  %v50_v51 = vld [vmem:[%s1524_s1] sm:$0xf]  ;;  %s1003_s1 = smov [#allocation4]  }
   0xb   :  { %v102_v26 = vmax.f32 %v100_v15, %v101_v24  ;;  %v110_v27 = vsel %vm1538_vm0, %v1143_v19, -inf  ;;  %v999_v28 = vmov 1983009808   ;;  %v1000_v44 = vmov 1   ;;  %s668_s23 = sshll.u32 %s1003_s1, 4  ;;  %s669_s23 = int_to_ptr.vmem [resolvable:$true] %s668_s23 }
   0xc   :  { %v72_v29 = vunpack.c.l.s4 %v999_v28  ;;  %v85_v30 = vrot.slane %v84_v22, 4  ;;  %v94_v31 = vrot.slane %v93_v23, 4  ;;  %v111_v32 = vmax.f32 %v109_v16, %v110_v27  ;;  %s828_s24 = scalar_lea.vmem %s669_s23, 64  ;;  %p833_p1 = scmp.lt.s32.totalorder %s669_s23, %s669_s23 }
   0xd   :  { %v103_v33 = vrot.slane %v102_v26, 4  ;;  %v1153_v39 = vshrl.u32 %v74_v25, 7  ;;  %v70_v45 = vcombine.low %v1000_v44, %v1000_v44  ;;  %v1001_v53 = vmov 1966171168   ;;  %p829_p0 = scmp.ne.s32.totalorder %s669_s23, %s828_s24  ;;  %p834_p2 = scmp.lt.s32.totalorder %s828_s24, %s828_s24 }
   0xe   :  { %v86_v34 = vmax.f32 %v84_v22, %v85_v30  ;;  %v95_v35 = vmax.f32 %v93_v23, %v94_v31  ;;  %v112_v36 = vrot.slane %v111_v32, 4  ;;  %v73_v38 = vunpack.c.0.s8 %v72_v29 }
   0xf   :  { %v104_v37 = vmax.f32 %v102_v26, %v103_v33  ;;  %v207_v54 = vunpack.c.l.s4 %v1001_v53  ;;  %vm63_vm1 = vcmp.ne.s32.totalorder %v50_v51, 4294967295  ;;  %v216_v44 = vsub.s32 0, %v1153_v39  ;;  %p835_p3 = por %p834_p2, %p833_p1 }
  0x10   :  { %v87_v40 = vrot.slane %v86_v34, 2  ;;  %v96_v41 = vrot.slane %v95_v35, 2  ;;  %v113_v43 = vmax.f32 %v111_v32, %v112_v36  ;;  %v1156_v46 = vsub.s32 %v73_v38, %v1153_v39 }
  0x11   :  { %v105_v42 = vrot.slane %v104_v37, 2  ;;  %v208_v62 = vunpack.c.0.s8 %v207_v54  ;;  %vm483_vm4 = vcmask 1041408   ;;  %p836_p4 = pnand %p835_p3, %p829_p0 }
  0x12   :  { %v88_v47 = vmax.f32 %v86_v34, %v87_v40  ;;  %v97_v48 = vmax.f32 %v95_v35, %v96_v41  ;;  %v114_v50 = vrot.slane %v113_v43, 2  ;;  %v77_v52 = vrot.slane %v70_v45, %v1156_v46 }
  0x13   :  { %v106_v49 = vmax.f32 %v104_v37, %v105_v42  ;;  %v211_v25 = vsub.s32 %v208_v62, %v1153_v39 }
  0x14   :  { %v89_v55 = vrot.slane %v88_v47, 1  ;;  %v98_v56 = vrot.slane %v97_v48, 1  ;;  %v115_v58 = vmax.f32 %v113_v43, %v114_v50  ;;  %vm1166_vm2 = vcmp.ne.s32.totalorder %v77_v52, 0 }
  0x15   :  { %v107_v57 = vrot.slane %v106_v49, 1  ;;  %vm1188_vm3 = vmand %vm63_vm1, %vm1166_vm2 }
  0x16   :  { %v1162_v59 = vmax.f32 %v88_v47, %v89_v55  ;;  %v1164_v60 = vmax.f32 %v97_v48, %v98_v56  ;;  %v116_v0 = vrot.slane %v115_v58, 1  ;;  %v583_v28 = vsel %vm1188_vm3, 1, %v998_v2 }
  0x17   :  { %v1170_v63 = vmax.f32 %v106_v49, %v107_v57  ;;  %v80_v32 = vsel %vm1188_vm3, %v50_v51, 0  ;;  %v590_v40 = vrot.slane %v583_v28, %v1156_v46  ;;  %v220_v47 = vsub.s32 1, %v1153_v39 }
  0x18   :  { %v118_v1 = vsub.f32 %v1080_v4, %v1162_v59  ;;  %v119_v3 = vsub.f32 %v1085_v5, %v1164_v60  ;;  %v120_v12 = vsub.f32 %v1100_v8, %v1162_v59  ;;  %v121_v14 = vsub.f32 %v1105_v9, %v1164_v60 }
  0x19   :  { %v1180_v15 = vmax.f32 %v115_v58, %v116_v0  ;;  %v122_v16 = vsub.f32 %v1122_v13, %v1162_v59  ;;  %v123_v20 = vsub.f32 %v1133_v17, %v1164_v60  ;;  %v124_v22 = vsub.f32 %v1090_v6, %v1170_v63 }
  0x1a   :  { %v130_v23 = vmul.f32 1.442695, %v118_v1  ;;  %v132_v24 = vmul.f32 1.442695, %v119_v3  ;;  %v134_v27 = vmul.f32 1.442695, %v120_v12  ;;  %v126_v29 = vsub.f32 %v1110_v10, %v1170_v63 }
  0x1b   :  { %v125_v26 = vsub.f32 %v1095_v7, %v1180_v15  ;;  %v136_v30 = vmul.f32 1.442695, %v121_v14  ;;  %v138_v31 = vmul.f32 1.442695, %v122_v16  ;;  %v127_v33 = vsub.f32 %v1115_v11, %v1180_v15 }
  0x1c   :  { %788 = vpow2.f32 %v130_v23  ;;  %v140_v34 = vmul.f32 1.442695, %v123_v20  ;;  %v128_v35 = vsub.f32 %v1138_v18, %v1170_v63  ;;  %v142_v36 = vmul.f32 1.442695, %v124_v22 }
  0x1d   :  { %790 = vpow2.f32 %v132_v24  ;;  %v129_v37 = vsub.f32 %v1143_v19, %v1180_v15  ;;  %v144_v38 = vmul.f32 1.442695, %v125_v26  ;;  %v212_v41 = vrot.slane %v80_v32, %v211_v25 }
  0x1e   :  { %792 = vpow2.f32 %v134_v27  ;;  %v146_v42 = vmul.f32 1.442695, %v126_v29  ;;  %v148_v43 = vmul.f32 1.442695, %v127_v33  ;;  %v150_v45 = vmul.f32 1.442695, %v128_v35 }
  0x1f   :  { %794 = vpow2.f32 %v136_v30  ;;  %v152_v48 = vmul.f32 1.442695, %v129_v37  ;;  %v591_v49 = vcombine.high %v590_v40, %v590_v40  ;;  %v213_v50 = vcombine.high %v212_v41, %v212_v41 }
  0x20   :  { %796 = vpow2.f32 %v138_v31  ;;  %v1213_v51 = vrot.slane %v212_v41, %v216_v44  ;;  %v592_v52 = vsel %vm483_vm4, %v590_v40, 0  ;;  %v1216_v53 = vrot.slane %v212_v41, %v220_v47 }
  0x21   :  { %798 = vpow2.f32 %v140_v34  ;;  %v593_v54 = vsel %vm483_vm4, %v591_v49, 0  ;;  %v1220_v56 = vadd.s32 8, %v1153_v39  ;;  %v1223_v57 = vadd.s32 16, %v1153_v39 }
  0x22   :  { %800 = vpow2.f32 %v142_v36  ;;  %v594_v55 = vadd.s32 %v593_v54, %v592_v52  ;;  %v1225_v58 = vrot.slane %v213_v50, %v216_v44  ;;  %vm230_vm5 = vcmp.eq.s32.totalorder %v1153_v39, %v1213_v51 }
  0x23   :  { %802 = vpow2.f32 %v144_v38  ;;  %v1229_v3 = vrot.slane %v213_v50, %v220_v47  ;;  %vm231_vm6 = vcmp.eq.s32.totalorder %v1153_v39, %v1216_v53  ;;  %vm1537_vm7 = vcmp.eq.s32.totalorder %v1220_v56, %v1213_v51 }
  0x24   :  { %804 = vpow2.f32 %v146_v42  ;;  %v596_v62 = vshrl.u32 %v594_v55, 16  ;;  %v595_v0 = vand.u32 65535, %v594_v55  ;;  %vm1536_vm8 = vcmp.eq.s32.totalorder %v1220_v56, %v1216_v53 }
  0x25   :  { %806 = vpow2.f32 %v148_v43  ;;  %vm234_vm9 = vcmp.eq.s32.totalorder %v1223_v57, %v1213_v51  ;;  %v242_v22 = vsel %vm230_vm5, %v1080_v4, 0.0  ;;  %vm235_vm10 = vcmp.eq.s32.totalorder %v1223_v57, %v1216_v53 }
  0x26   :  { %808 = vpow2.f32 %v150_v45  ;;  %v598_v14 = vcvt.s32.f32 %v596_v62  ;;  %v597_v16 = vcvt.s32.f32 %v595_v0  ;;  %vm236_vm11 = vcmp.eq.s32.totalorder %v1153_v39, %v1225_v58 }
  0x27   :  { %810 = vpow2.f32 %v152_v48  ;;  %v243_v24 = vsel %vm231_vm6, %v1085_v5, 0.0  ;;  %v244_v25 = vsel %vm1537_vm7, %v1100_v8, 0.0  ;;  %vm1539_vm12 = vcmp.eq.s32.totalorder %v1153_v39, %v1229_v3 }
  0x28   :  { %599 = vadd.xlane.f32.xlu0 %v597_v16  ;;  %v245_v27 = vsel %vm1536_vm8, %v1105_v9, 0.0  ;;  %v246_v5 = vsel %vm234_vm9, %v1122_v13, 0.0  ;;  %vm1535_vm13 = vcmp.eq.s32.totalorder %v1220_v56, %v1225_v58  ;;  %vm1534_vm14 = vcmp.eq.s32.totalorder %v1220_v56, %v1229_v3 }
  0x29   :  { %v789_v1 = vpop.eup %788  ;;  %601 = vadd.xlane.f32.xlu1 %v598_v14  ;;  %v247_v9 = vsel %vm235_vm10, %v1133_v17, 0.0  ;;  %v248_v13 = vsel %vm236_vm11, %v1090_v6, 0.0  ;;  %v254_v31 = vadd.f32 %v244_v25, %v242_v22  ;;  %v263_v35 = vadd.f32 %v245_v27, %v243_v24 }
  0x2a   :  { %v791_v12 = vpop.eup %790  ;;  %vm240_vm15 = vcmp.eq.s32.totalorder %v1223_v57, %v1225_v58  ;;  %v255_v37 = vsel %vm1538_vm0, %v246_v5, 0.0  ;;  %v249_v17 = vsel %vm1539_vm12, %v1095_v7, 0.0  ;;  %vm241_vm1 = vcmp.eq.s32.totalorder %v1223_v57, %v1229_v3 }
  0x2b   :  { %v793_v20 = vpop.eup %792  ;;  %v264_v6 = vsel %vm1538_vm0, %v247_v9, 0.0  ;;  %v250_v42 = vsel %vm1535_vm13, %v1110_v10, 0.0  ;;  %v251_v43 = vsel %vm1534_vm14, %v1115_v11, 0.0  ;;  %v252_v49 = vsel %vm240_vm15, %v1138_v18, 0.0 }
  0x2c   :  { %v795_v23 = vpop.eup %794  ;;  %v154_v26 = vadd.f32 %v793_v20, %v789_v1  ;;  %v256_v50 = vadd.f32 %v255_v37, %v254_v31  ;;  %v253_v11 = vsel %vm241_vm1, %v1143_v19, 0.0  ;;  %v265_v55 = vadd.f32 %v264_v6, %v263_v35 }
  0x2d   :  { %v797_v4 = vpop.eup %796  ;;  %v163_v28 = vadd.f32 %v795_v23, %v791_v12  ;;  %v272_v62 = vadd.f32 %v250_v42, %v248_v13  ;;  %v281_v14 = vadd.f32 %v251_v43, %v249_v17  ;;  %v273_v18 = vsel %vm1538_vm0, %v252_v49, 0.0 }
  0x2e   :  { %v799_v29 = vpop.eup %798  ;;  %v155_v8 = vsel %vm1538_vm0, %v797_v4, 0.0  ;;  %v257_v24 = vrot.slane %v256_v50, 4  ;;  %v282_v25 = vsel %vm1538_vm0, %v253_v11, 0.0  ;;  %v266_v27 = vrot.slane %v265_v55, 4 }
  0x2f   :  { %v801_v30 = vpop.eup %800  ;;  %v156_v32 = vadd.f32 %v155_v8, %v154_v26  ;;  %v164_v33 = vsel %vm1538_vm0, %v799_v29, 0.0  ;;  %v274_v5 = vadd.f32 %v273_v18, %v272_v62  ;;  %v283_v9 = vadd.f32 %v282_v25, %v281_v14 }
  0x30   :  { %v803_v34 = vpop.eup %802  ;;  %v165_v36 = vadd.f32 %v164_v33, %v163_v28  ;;  %v258_v31 = vadd.f32 %v257_v24, %v256_v50  ;;  %vm378_vm14 = vcmask 1041409   ;;  %vm380_vm13 = vcmask 1043459  }
  0x31   :  { %v805_v38 = vpop.eup %804  ;;  %v157_v40 = vrot.slane %v156_v32, 4  ;;  %vm382_vm8 = vcmask 1045509   ;;  %vm384_vm7 = vcmask 1047559  }
  0x32   :  { %v807_v41 = vpop.eup %806  ;;  %v166_v44 = vrot.slane %v165_v36, 4  ;;  %v172_v45 = vadd.f32 %v805_v38, %v801_v30  ;;  %v284_v38 = vrot.slane %v283_v9, 4 }
  0x33   :  { %v809_v7 = vpop.eup %808  ;;  %v158_v47 = vadd.f32 %v157_v40, %v156_v32  ;;  %v181_v48 = vadd.f32 %v807_v41, %v803_v34  ;;  %v267_v34 = vadd.f32 %v266_v27, %v265_v55  ;;  %v259_v40 = vrot.slane %v258_v31, 2 }
  0x34   :  { %v811_v52 = vpop.eup %810  ;;  %v167_v54 = vadd.f32 %v166_v44, %v165_v36  ;;  %v173_v10 = vsel %vm1538_vm0, %v809_v7, 0.0  ;;  %v275_v36 = vrot.slane %v274_v5, 4 }
  0x35   :  { %v159_v0 = vrot.slane %v158_v47, 2  ;;  %v174_v1 = vadd.f32 %v173_v10, %v172_v45  ;;  %v182_v12 = vsel %vm1538_vm0, %v811_v52, 0.0  ;;  %v268_v41 = vrot.slane %v267_v34, 2 }
  0x36   :  { %v168_v16 = vrot.slane %v167_v54, 2  ;;  %v183_v20 = vadd.f32 %v182_v12, %v181_v48  ;;  %v276_v43 = vadd.f32 %v275_v36, %v274_v5  ;;  %v285_v45 = vadd.f32 %v284_v38, %v283_v9 }
  0x37   :  { %v160_v22 = vadd.f32 %v159_v0, %v158_v47  ;;  %v175_v23 = vrot.slane %v174_v1, 4  ;;  %v260_v7 = vadd.f32 %v259_v40, %v258_v31  ;;  %v269_v47 = vadd.f32 %v268_v41, %v267_v34 }
  0x38   :  { %v169_v26 = vadd.f32 %v168_v16, %v167_v54  ;;  %v184_v4 = vrot.slane %v183_v20, 4  ;;  %v277_v48 = vrot.slane %v276_v43, 2  ;;  %v286_v49 = vrot.slane %v285_v45, 2 }
  0x39   :  { %v161_v19 = vrot.slane %v160_v22, 1  ;;  %v176_v28 = vadd.f32 %v175_v23, %v174_v1  ;;  %v261_v50 = vrot.slane %v260_v7, 1  ;;  %v270_v52 = vrot.slane %v269_v47, 1 }
  0x3a   :  { %v170_v29 = vrot.slane %v169_v26, 1  ;;  %v185_v8 = vadd.f32 %v184_v4, %v183_v20  ;;  %v278_v54 = vadd.f32 %v277_v48, %v276_v43  ;;  %v287_v11 = vadd.f32 %v286_v49, %v285_v45 }
  0x3b   :  { %v162_v30 = vadd.f32 %v161_v19, %v160_v22  ;;  %v177_v13 = vrot.slane %v176_v28, 2  ;;  %v1309_v0 = vadd.f32 %v261_v50, %v260_v7  ;;  %v1311_v12 = vadd.f32 %v270_v52, %v269_v47 }
  0x3c   :  { %v171_v32 = vadd.f32 %v170_v29, %v169_v26  ;;  %v186_v33 = vrot.slane %v185_v8, 2  ;;  %v279_v16 = vrot.slane %v278_v54, 1  ;;  %v288_v18 = vrot.slane %v287_v11, 1 }
  0x3d   :  { %v178_v35 = vadd.f32 %v177_v13, %v176_v28  ;;  %812 = vlog2.f32 %v162_v30 }
  0x3e   :  { %v187_v37 = vadd.f32 %v186_v33, %v185_v8  ;;  %814 = vlog2.f32 %v171_v32  ;;  %v1323_v4 = vadd.f32 %v279_v16, %v278_v54 }
  0x3f   :  { %v179_v17 = vrot.slane %v178_v35, 1 }
  0x40   :  { %v188_v6 = vrot.slane %v187_v37, 1 }
  0x41   :  { %v180_v42 = vadd.f32 %v179_v17, %v178_v35 }
  0x42   :  { %v189_v44 = vadd.f32 %v188_v6, %v187_v37 }
  0x43   :  { %816 = vlog2.f32 %v180_v42 }
  0x44   :  { %818 = vlog2.f32 %v189_v44 }
  0x4a   :  { %v813_v10 = vpop.eup %812 }
  0x4b   :  { %v815_v55 = vpop.eup %814  ;;  %v191_v62 = vmul.f32 0.6931472, %v813_v10 }
  0x4c   :  { %v193_v1 = vmul.f32 0.6931472, %v815_v55 }
  0x4d   :  { %v1314_v14 = vadd.f32 %v191_v62, %v1162_v59  ;;  %v1325_v59 = vadd.f32 %v288_v18, %v287_v11 }
  0x4e   :  { %v1317_v20 = vadd.f32 %v193_v1, %v1164_v60 }
  0x4f   :  { %v425_v22 = vsub.f32 %v1309_v0, %v1314_v14 }
  0x50   :  { %v817_v23 = vpop.eup %816  ;;  %v426_v24 = vsub.f32 %v1311_v12, %v1317_v20 }
  0x51   :  { %v819_v25 = vpop.eup %818  ;;  %v195_v26 = vmul.f32 0.6931472, %v817_v23  ;;  %v429_v27 = vmul.f32 1.442695, %v425_v22 }
  0x52   :  { %v197_v19 = vmul.f32 0.6931472, %v819_v25  ;;  %v431_v28 = vmul.f32 1.442695, %v426_v24 }
  0x53   :  { %v1328_v60 = vadd.f32 %v195_v26, %v1170_v63  ;;  %820 = vpow2.f32 %v429_v27 }
  0x54   :  { %v1331_v5 = vadd.f32 %v197_v19, %v1180_v15  ;;  %822 = vpow2.f32 %v431_v28 }
  0x55   :  { %v427_v29 = vsub.f32 %v1323_v4, %v1328_v60 }
  0x56   :  { %v428_v8 = vsub.f32 %v1325_v59, %v1331_v5 }
  0x57   :  { %v433_v9 = vmul.f32 1.442695, %v427_v29 }
  0x58   :  { %v435_v30 = vmul.f32 1.442695, %v428_v8 }
  0x59   :  { %824 = vpow2.f32 %v433_v9 }
  0x5a   :  { %826 = vpow2.f32 %v435_v30 }
  0x60   :  { %v821_v13 = vpop.eup %820 }
  0x61   :  { %v823_v31 = vpop.eup %822 }
  0x62   :  { %v441_v63 = vcombine.low %v821_v13, %v823_v31 }
  0x64   :  { %v448_v15 = vrot.slane %v441_v63, %v1156_v46 }
  0x66   :  { %v825_v32 = vpop.eup %824 }
  0x67   :  { %v827_v33 = vpop.eup %826 }
  0x68   :  { %v449_v34 = vcombine.low %v825_v32, %v827_v33 }
  0x6a   :  { %v456_v35 = vrot.slane %v449_v34, %v1156_v46 }
  0x6c   :  { %v459_v36 = vrot.slane %v456_v35, 7 }
  0x6e   :  { %v460_v37 = vsel %vm378_vm14, %v459_v36, %v448_v15 }
  0x6f   :  { %v461_v38 = vsel %vm380_vm13, %v459_v36, %v460_v37 }
  0x70   :  { %v462_v17 = vsel %vm382_vm8, %v459_v36, %v461_v38 }
  0x71   :  { %v463_v40 = vsel %vm384_vm7, %v459_v36, %v462_v17 }
  0x72   :  { %v465_v6 = vsel %vm1188_vm3, %v463_v40, 1.0 }
  0x73   :  { %vm468_vm0 = vcmp.le.f32.partialorder %v465_v6, 0.7  ;;  %466 = vst [vmem:[#allocation2] sm:$0xf] %v465_v6 }
  0x74   :  { %vm1347_vm12 = vmand %vm468_vm0, %vm1166_vm2  ;;  %vm1546_vm0 = vcmp.eq.s32.totalorder %v1153_v39, %v1229_v3  ;;  %vm1547_vm2 = vcmask 1042432  }
  0x75   :  { %v618_v42 = vsel %vm1347_vm12, 1, %v998_v2 }
  0x76   :  { %v625_v43 = vrot.slane %v618_v42, %v1156_v46 }
  0x78   :  { %v626_v44 = vcombine.high %v625_v43, %v625_v43  ;;  %v627_v45 = vsel %vm483_vm4, %v625_v43, 0  ;;  %v388_v43 = vsub.f32 %v1314_v14, %v1309_v0 }
  0x7a   :  { %v628_v7 = vsel %vm483_vm4, %v626_v44, 0  ;;  %v389_v44 = vsub.f32 %v1317_v20, %v1311_v12 }
  0x7b   :  { %v629_v49 = vadd.s32 %v628_v7, %v627_v45 }
  0x7d   :  { %v631_v24 = vshrl.u32 %v629_v49, 16  ;;  %v630_v57 = vand.u32 65535, %v629_v49  ;;  %v390_v49 = vsub.f32 %v1328_v60, %v1323_v4 }
  0x7f   :  { %v633_v9 = vcvt.s32.f32 %v631_v24  ;;  %v632_v30 = vcvt.s32.f32 %v630_v57 }
  0x80   :  { %v293_v47 = vpop.permute.xlu0 %292  ;;  %v303_v48 = vpop.permute.xlu1 %302 }
  0x81   :  { %v305_v61 = vsel %vm230_vm5, %v293_v47, 0.0  ;;  %v306_v50 = vsel %vm231_vm6, %v293_v47, 0.0  ;;  %v309_v52 = vsel %vm234_vm9, %v303_v48, 0.0  ;;  %v310_v54 = vsel %vm235_vm10, %v303_v48, 0.0  ;;  %vm1548_vm5 = vmmov %vm1547_vm2  ;;  %636 = vadd.xlane.f32.xlu0 %v633_v9  ;;  %634 = vadd.xlane.f32.xlu1 %v632_v30 }
  0x82   :  { %v315_v10 = vsel %vm240_vm15, %v303_v48, 0.0  ;;  %v316_v11 = vsel %vm241_vm1, %v303_v48, 0.0  ;;  %v311_v55 = vsel %vm236_vm11, %v293_v47, 0.0  ;;  %v312_v62 = vsel %vm1546_vm0, %v293_v47, 0.0  ;;  %vm1549_vm6 = vmmov %vm1547_vm2 }
  0x83   :  { %v318_v1 = vsel %vm1547_vm2, %v309_v52, 0.0  ;;  %v327_v16 = vsel %vm1548_vm5, %v310_v54, 0.0  ;;  %v336_v22 = vsel %vm1549_vm6, %v315_v10, 0.0  ;;  %vm1550_vm9 = vmmov %vm1547_vm2  ;;  %vm1551_vm10 = vcmp.eq.s32.totalorder %v1220_v56, %v1213_v51 }
  0x84   :  { %v298_v18 = vpop.permute.xlu0 %297  ;;  %v345_v23 = vsel %vm1550_vm9, %v316_v11, 0.0  ;;  %vm1552_vm11 = vcmp.eq.s32.totalorder %v1220_v56, %v1216_v53  ;;  %vm1553_vm15 = vcmp.eq.s32.totalorder %v1220_v56, %v1225_v58  ;;  %vm1554_vm1 = vcmp.eq.s32.totalorder %v1220_v56, %v1229_v3 }
  0x85   :  { %v307_v25 = vsel %vm1551_vm10, %v298_v18, 0.0  ;;  %v308_v39 = vsel %vm1552_vm11, %v298_v18, 0.0  ;;  %v313_v26 = vsel %vm1553_vm15, %v298_v18, 0.0  ;;  %v314_v27 = vsel %vm1554_vm1, %v298_v18, 0.0 }
  0x86   :  { %v317_v19 = vadd.f32 %v307_v25, %v305_v61  ;;  %v326_v28 = vadd.f32 %v308_v39, %v306_v50  ;;  %v335_v29 = vadd.f32 %v313_v26, %v311_v55  ;;  %v344_v8 = vadd.f32 %v314_v27, %v312_v62 }
  0x87   :  { %v391_v61 = vsub.f32 %v1331_v5, %v1325_v59 }
  0x88   :  { %v319_v51 = vadd.f32 %v318_v1, %v317_v19  ;;  %v328_v13 = vadd.f32 %v327_v16, %v326_v28  ;;  %v337_v31 = vadd.f32 %v336_v22, %v335_v29  ;;  %v346_v32 = vadd.f32 %v345_v23, %v344_v8 }
  0x8a   :  { %v320_v53 = vrot.slane %v319_v51, 4  ;;  %v329_v63 = vrot.slane %v328_v13, 4  ;;  %v338_v58 = vrot.slane %v337_v31, 4  ;;  %v347_v33 = vrot.slane %v346_v32, 4 }
  0x8c   :  { %v321_v34 = vadd.f32 %v320_v53, %v319_v51  ;;  %v330_v15 = vadd.f32 %v329_v63, %v328_v13  ;;  %v339_v56 = vadd.f32 %v338_v58, %v337_v31  ;;  %v348_v3 = vadd.f32 %v347_v33, %v346_v32 }
  0x8e   :  { %v322_v35 = vrot.slane %v321_v34, 2  ;;  %v331_v36 = vrot.slane %v330_v15, 2  ;;  %v340_v37 = vrot.slane %v339_v56, 2  ;;  %v349_v38 = vrot.slane %v348_v3, 2 }
  0x90   :  { %v323_v17 = vadd.f32 %v322_v35, %v321_v34  ;;  %v332_v40 = vadd.f32 %v331_v36, %v330_v15  ;;  %v341_v6 = vadd.f32 %v340_v37, %v339_v56  ;;  %v350_v42 = vadd.f32 %v349_v38, %v348_v3 }
  0x91   :  { %v1002_v38 = vmov 0.0  }
  0x92   :  { %v324_v45 = vrot.slane %v323_v17, 1  ;;  %v333_v7 = vrot.slane %v332_v40, 1  ;;  %v342_v47 = vrot.slane %v341_v6, 1  ;;  %v351_v48 = vrot.slane %v350_v42, 1 }
  0x94   :  { %v325_v50 = vadd.f32 %v324_v45, %v323_v17  ;;  %v334_v52 = vadd.f32 %v333_v7, %v332_v40  ;;  %v343_v54 = vadd.f32 %v342_v47, %v341_v6  ;;  %v352_v10 = vadd.f32 %v351_v48, %v350_v42 }
  0x96   :  { %v357_v11 = vcombine.low %v325_v50, %v334_v52  ;;  %v365_v55 = vcombine.low %v343_v54, %v352_v10  ;;  %v392_v0 = vmul.f32 %v388_v43, %v325_v50  ;;  %v393_v14 = vmul.f32 %v389_v44, %v334_v52 }
  0x97   :  { %v394_v62 = vmul.f32 %v390_v49, %v343_v54  ;;  %v395_v12 = vmul.f32 %v391_v61, %v352_v10 }
  0x98   :  { %v372_v20 = vrot.slane %v365_v55, %v1156_v46  ;;  %v400_v1 = vcombine.low %v392_v0, %v393_v14  ;;  %v364_v18 = vrot.slane %v357_v11, %v1156_v46 }
  0x99   :  { %v408_v16 = vcombine.low %v394_v62, %v395_v12 }
  0x9a   :  { %v377_v4 = vrot.slane %v372_v20, 7  ;;  %v407_v22 = vrot.slane %v400_v1, %v1156_v46 }
  0x9b   :  { %v415_v60 = vrot.slane %v408_v16, %v1156_v46 }
  0x9c   :  { %v379_v59 = vsel %vm378_vm14, %v377_v4, %v364_v18 }
  0x9d   :  { %v381_v5 = vsel %vm380_vm13, %v377_v4, %v379_v59  ;;  %v418_v23 = vrot.slane %v415_v60, 7 }
  0x9e   :  { %v383_v24 = vsel %vm382_vm8, %v377_v4, %v381_v5 }
  0x9f   :  { %v385_v57 = vsel %vm384_vm7, %v377_v4, %v383_v24  ;;  %v419_v25 = vsel %vm378_vm14, %v418_v23, %v407_v22 }
  0xa0   :  { %v387_v39 = vsel %vm1188_vm3, %v385_v57, 0.0  ;;  %v420_v26 = vsel %vm380_vm13, %v418_v23, %v419_v25 }
  0xa1   :  { %v501_v27 = vsel %vm1347_vm12, %v387_v39, 0.0  ;;  %467 = vst [vmem:[#allocation4] sm:$0xf] %v387_v39  ;;  %v421_v19 = vsel %vm382_vm8, %v418_v23, %v420_v26  ;;  %v563_v28 = vrot.slane %v387_v39, %v1156_v46 }
  0xa2   :  { %v509_v29 = vrot.slane %v501_v27, %v1156_v46  ;;  %v422_v8 = vsel %vm384_vm7, %v418_v23, %v421_v19 }
  0xa3   :  { %v424_v9 = vsel %vm1188_vm3, %v422_v8, 0.0  ;;  %v564_v13 = vcombine.high %v563_v28, %v563_v28  ;;  %v567_v3 = vsel %vm483_vm4, %v563_v28, 0.0  ;;  %vm31_vm3 = vcmask 0  }
  0xa4   :  { %v510_v30 = vcombine.high %v509_v29, %v509_v29  ;;  %v471_v51 = vsel %vm1347_vm12, %v424_v9, 0.0  ;;  %v536_v31 = vrot.slane %v424_v9, %v1156_v46  ;;  %v513_v53 = vsel %vm483_vm4, %v509_v29, 0.0  ;;  %32 = vst.msk [vmem:[#allocation6] sm:$0x1] %vm31_vm3, %v1002_v38  ;;  %33 = vst.msk [vmem:[#allocation7] sm:$0x1] %vm31_vm3, %v1002_v38 }
  0xa5   :  { %v479_v32 = vrot.slane %v471_v51, %v1156_v46  ;;  %v568_v15 = vsel %vm483_vm4, %v564_v13, 0.0  ;;  %34 = vst.msk [vmem:[#allocation9] sm:$0x1] %vm31_vm3, %v1002_v38  ;;  %35 = vst.msk [vmem:[#allocation10] sm:$0x1] %vm31_vm3, %v1002_v38 }
  0xa6   :  { %v514_v63 = vsel %vm483_vm4, %v510_v30, 0.0  ;;  %v537_v34 = vcombine.high %v536_v31, %v536_v31  ;;  %v569_v35 = vadd.f32 %v568_v15, %v567_v3  ;;  %v540_v36 = vsel %vm483_vm4, %v536_v31, 0.0  ;;  %36 = vst.msk [vmem:[#allocation12] sm:$0x1] %vm31_vm3, %v998_v2  ;;  %37 = vst.msk [vmem:[#allocation13] sm:$0x1] %vm31_vm3, %v998_v2 }
  0xa7   :  { %v515_v58 = vadd.f32 %v514_v63, %v513_v53  ;;  %v480_v33 = vcombine.high %v479_v32, %v479_v32  ;;  %v484_v21 = vsel %vm483_vm4, %v479_v32, 0.0 }
  0xa8   :  { %v541_v46 = vsel %vm483_vm4, %v537_v34, 0.0 }
  0xa9   :  { %516 = vadd.xlane.f32.xlu1 %v515_v58  ;;  %v485_v41 = vsel %vm483_vm4, %v480_v33, 0.0  ;;  %v542_v37 = vadd.f32 %v541_v46, %v540_v36 }
  0xaa   :  { %v486_v56 = vadd.f32 %v485_v41, %v484_v21 }
  0xac   :  { %487 = vadd.xlane.f32.xlu0 %v486_v56 }
  0xad   :  { %570 = vadd.xlane.f32.xlu1 %v569_v35 }
  0xb0   :  { %543 = vadd.xlane.f32.xlu0 %v542_v37 }
  0xb1   :  { %839 = shalt.err (!%p836_p4)
}
  0xb2   :  { %671 = dma.vmem_to_hbm [thread:$0]  %s669_s23, 64, %s1527_s4, [#allocation5]  }
  0xb3   :  { %s1004_s2 = smov [#allocation2]  }
  0xb4   :  { %s658_s27 = sshll.u32 %s1004_s2, 4  ;;  %s659_s27 = int_to_ptr.vmem [resolvable:$true] %s658_s27 }
  0xb5   :  { %s848_s28 = scalar_lea.vmem %s659_s27, 64  ;;  %p853_p6 = scmp.lt.s32.totalorder %s659_s27, %s659_s27 }
  0xb6   :  { %p849_p5 = scmp.ne.s32.totalorder %s659_s27, %s848_s28  ;;  %p854_p7 = scmp.lt.s32.totalorder %s848_s28, %s848_s28 }
  0xb8   :  { %p855_p8 = por %p854_p7, %p853_p6 }
  0xba   :  { %p856_p9 = pnand %p855_p8, %p849_p5 }
  0xbc   :  { %859 = shalt.err (!%p856_p9)
}
  0xbd   :  { %661 = dma.vmem_to_hbm [thread:$0]  %s659_s27, 64, %s1526_s3, [#allocation3]   ;;  %v600_v2 = vpop.xlane.xlu0 %599  ;;  %v602_v17 = vpop.xlane.xlu1 %601  ;;  %v470_v33 = vld [vmem:[#allocation6] sm:$0x1]  ;;  %v500_v34 = vld [vmem:[#allocation7] sm:$0x1] }
  0xbe   :  { %v604_v6 = vcvt.f32.s32 %v602_v17  ;;  %v603_v45 = vcvt.f32.s32 %v600_v2  ;;  %s1005_s3 = smov [#allocation7]   ;;  %s1006_s11 = smov [#allocation10]   ;;  %v528_v3 = vld [vmem:[#allocation9] sm:$0x1]  ;;  %v555_v35 = vld [vmem:[#allocation10] sm:$0x1] }
  0xbf   :  { %s688_s4 = sshll.u32 %s1005_s3, 4  ;;  %s708_s12 = sshll.u32 %s1006_s11, 4  ;;  %v582_v36 = vld [vmem:[#allocation12] sm:$0x1]  ;;  %v617_v2 = vld [vmem:[#allocation13] sm:$0x1]  ;;  %s1451_s4 = int_to_ptr.vmem [resolvable:$true] %s688_s4  ;;  %s1453_s12 = int_to_ptr.vmem [resolvable:$true] %s708_s12 }
  0xc0   :  { %v605_v44 = vshll.u32 %v604_v6, 16  ;;  %s1007_s13 = smov [#allocation6]   ;;  %s1008_s17 = smov [#allocation9]  }
  0xc1   :  { %s678_s14 = sshll.u32 %s1007_s13, 4  ;;  %s698_s18 = sshll.u32 %s1008_s17, 4  ;;  %s1455_s14 = int_to_ptr.vmem [resolvable:$true] %s678_s14  ;;  %s1459_s18 = int_to_ptr.vmem [resolvable:$true] %s698_s18 }
  0xc2   :  { %v606_v48 = vadd.s32 %v605_v44, %v603_v45  ;;  %s1009_s19 = smov [#allocation12]   ;;  %s1010_s0 = smov [#allocation13]  }
  0xc3   :  { %s718_s20 = sshll.u32 %s1009_s19, 4  ;;  %s728_s22 = sshll.u32 %s1010_s0, 4  ;;  %s1461_s20 = int_to_ptr.vmem [resolvable:$true] %s718_s20  ;;  %s1463_s22 = int_to_ptr.vmem [resolvable:$true] %s728_s22 }
  0xc4   :  { %v607_v61 = vrot.slane %v606_v48, 4  ;;  %s868_s25 = scalar_lea.vmem %s1451_s4, 16  ;;  %s872_s26 = scalar_lea.vmem %s1451_s4, 32 }
  0xc5   :  { %p869_p10 = scmp.ne.s32.totalorder %s1451_s4, %s868_s25  ;;  %p873_p11 = scmp.lt.s32.totalorder %s1451_s4, %s1451_s4 }
  0xc6   :  { %v608_v55 = vadd.s32 %v607_v61, %v606_v48  ;;  %p874_p12 = scmp.lt.s32.totalorder %s872_s26, %s868_s25 }
  0xc8   :  { %v609_v5 = vrot.slane %v608_v55, 2  ;;  %p875_p13 = por %p874_p12, %p873_p11 }
  0xca   :  { %v610_v19 = vadd.s32 %v609_v5, %v608_v55  ;;  %p876_p0 = pnand %p875_p13, %p869_p10 }
  0xcc   :  { %v611_v13 = vrot.slane %v610_v19, 1 }
  0xce   :  { %v612_v63 = vadd.s32 %v611_v13, %v610_v19 }
 0x10a   :  { %v637_v40 = vpop.xlane.xlu0 %636  ;;  %v635_v43 = vpop.xlane.xlu1 %634 }
 0x10b   :  { %v639_v42 = vcvt.f32.s32 %v637_v40  ;;  %v638_v47 = vcvt.f32.s32 %v635_v43 }
 0x10d   :  { %v640_v7 = vshll.u32 %v639_v42, 16 }
 0x10f   :  { %v641_v49 = vadd.s32 %v640_v7, %v638_v47 }
 0x111   :  { %v642_v52 = vrot.slane %v641_v49, 4 }
 0x113   :  { %v643_v62 = vadd.s32 %v642_v52, %v641_v49 }
 0x115   :  { %v644_v23 = vrot.slane %v643_v62, 2 }
 0x117   :  { %v645_v28 = vadd.s32 %v644_v23, %v643_v62 }
 0x119   :  { %v646_v31 = vrot.slane %v645_v28, 1 }
 0x11b   :  { %v647_v58 = vadd.s32 %v646_v31, %v645_v28 }
 0x132   :  { %v517_v50 = vpop.xlane.xlu1 %516 }
 0x133   :  { %v518_v54 = vrot.slane %v517_v50, 4 }
 0x135   :  { %v519_v10 = vadd.f32 %v518_v54, %v517_v50  ;;  %v488_v11 = vpop.xlane.xlu0 %487 }
 0x136   :  { %v489_v0 = vrot.slane %v488_v11, 4  ;;  %v571_v14 = vpop.xlane.xlu1 %570 }
 0x137   :  { %v520_v12 = vrot.slane %v519_v10, 2  ;;  %v572_v20 = vrot.slane %v571_v14, 4 }
 0x138   :  { %v490_v1 = vadd.f32 %v489_v0, %v488_v11 }
 0x139   :  { %v573_v16 = vadd.f32 %v572_v20, %v571_v14  ;;  %v544_v18 = vpop.xlane.xlu0 %543  ;;  %v521_v4 = vadd.f32 %v520_v12, %v519_v10 }
 0x13a   :  { %v491_v60 = vrot.slane %v490_v1, 2  ;;  %v545_v59 = vrot.slane %v544_v18, 4 }
 0x13b   :  { %v574_v22 = vrot.slane %v573_v16, 2  ;;  %v522_v39 = vrot.slane %v521_v4, 1 }
 0x13c   :  { %v546_v24 = vadd.f32 %v545_v59, %v544_v18  ;;  %v492_v57 = vadd.f32 %v491_v60, %v490_v1 }
 0x13d   :  { %v575_v25 = vadd.f32 %v574_v22, %v573_v16  ;;  %v523_v9 = vadd.f32 %v522_v39, %v521_v4 }
 0x13e   :  { %v547_v26 = vrot.slane %v546_v24, 2  ;;  %v493_v27 = vrot.slane %v492_v57, 1 }
 0x13f   :  { %v576_v30 = vrot.slane %v575_v25, 1 }
 0x140   :  { %v548_v29 = vadd.f32 %v547_v26, %v546_v24  ;;  %v494_v8 = vadd.f32 %v493_v27, %v492_v57 }
 0x141   :  { %v577_v53 = vadd.f32 %v576_v30, %v575_v25 }
 0x142   :  { %761 = vpush %v494_v8  ;;  %v549_v51 = vrot.slane %v548_v29, 1 }
 0x143   :  { %763 = vpush %v523_v9 }
 0x144   :  { %v550_v32 = vadd.f32 %v549_v51, %v548_v29 }
 0x146   :  { %765 = vpush %v550_v32 }
 0x147   :  { %767 = vpush %v577_v53 }
 0x148   :  { %769 = vpush %v612_v63 }
 0x149   :  { %771 = vpush %v647_v58 }
 0x173   :  { %s762_s15 = spop %761 }
 0x174   :  { %v496_v15 = vstv %s762_s15  ;;  %s764_s16 = spop %763 }
 0x175   :  { %v497_v21 = vadd.f32 %v496_v15, %v470_v33  ;;  %v525_v41 = vstv %s764_s16 }
 0x176   :  { %v526_v56 = vadd.f32 %v525_v41, %v500_v34 }
 0x177   :  { %499 = vst.msk [vmem:[#allocation6] sm:$0x1] %vm31_vm3, %v497_v21  ;;  %s766_s21 = spop %765 }
 0x178   :  { %527 = vst.msk [vmem:[#allocation7] sm:$0x1] %vm31_vm3, %v526_v56  ;;  %v552_v46 = vstv %s766_s21  ;;  %s768_s1 = spop %767 }
 0x179   :  { %v553_v37 = vadd.f32 %v552_v46, %v528_v3  ;;  %v579_v38 = vstv %s768_s1  ;;  %s770_s23 = spop %769 }
 0x17a   :  { %v580_v17 = vadd.f32 %v579_v38, %v555_v35  ;;  %v614_v40 = vstv %s770_s23  ;;  %s772_s24 = spop %771 }
 0x17b   :  { %554 = vst.msk [vmem:[#allocation9] sm:$0x1] %vm31_vm3, %v553_v37  ;;  %v615_v6 = vadd.s32 %v614_v40, %v582_v36  ;;  %v649_v42 = vstv %s772_s24 }
 0x17c   :  { %879 = shalt.err (!%p876_p0)
}
 0x17d   :  { %691 = dma.vmem_to_hbm [thread:$0]  %s1451_s4, 16, %s1529_s6, [#allocation8]   ;;  %581 = vst.msk [vmem:[#allocation10] sm:$0x1] %vm31_vm3, %v580_v17  ;;  %v650_v43 = vadd.s32 %v649_v42, %v617_v2 }
 0x17e   :  { %s888_s28 = scalar_lea.vmem %s1455_s14, 16  ;;  %s892_s29 = scalar_lea.vmem %s1455_s14, 32 }
 0x17f   :  { %p889_p1 = scmp.ne.s32.totalorder %s1455_s14, %s888_s28  ;;  %p893_p2 = scmp.lt.s32.totalorder %s1455_s14, %s1455_s14 }
 0x180   :  { %p894_p3 = scmp.lt.s32.totalorder %s892_s29, %s888_s28 }
 0x182   :  { %p895_p4 = por %p894_p3, %p893_p2 }
 0x184   :  { %p896_p5 = pnand %p895_p4, %p889_p1 }
 0x186   :  { %899 = shalt.err (!%p896_p5)
}
 0x187   :  { %681 = dma.vmem_to_hbm [thread:$0]  %s1455_s14, 16, %s1528_s5, [#allocation5]   ;;  %616 = vst.msk [vmem:[#allocation12] sm:$0x1] %vm31_vm3, %v615_v6 }
 0x188   :  { %s908_s6 = scalar_lea.vmem %s1453_s12, 16  ;;  %s912_s4 = scalar_lea.vmem %s1453_s12, 32 }
 0x189   :  { %p909_p6 = scmp.ne.s32.totalorder %s1453_s12, %s908_s6  ;;  %p913_p7 = scmp.lt.s32.totalorder %s1453_s12, %s1453_s12 }
 0x18a   :  { %p914_p8 = scmp.lt.s32.totalorder %s912_s4, %s908_s6 }
 0x18c   :  { %p915_p9 = por %p914_p8, %p913_p7 }
 0x18e   :  { %p916_p10 = pnand %p915_p9, %p909_p6 }
 0x190   :  { %919 = shalt.err (!%p916_p10)
}
 0x191   :  { %711 = dma.vmem_to_hbm [thread:$0]  %s1453_s12, 16, %s1531_s8, [#allocation11]   ;;  %651 = vst.msk [vmem:[#allocation13] sm:$0x1] %vm31_vm3, %v650_v43 }
 0x192   :  { %s928_s5 = scalar_lea.vmem %s1459_s18, 16  ;;  %s932_s14 = scalar_lea.vmem %s1459_s18, 32 }
 0x193   :  { %p929_p11 = scmp.ne.s32.totalorder %s1459_s18, %s928_s5  ;;  %p933_p12 = scmp.lt.s32.totalorder %s1459_s18, %s1459_s18 }
 0x194   :  { %p934_p13 = scmp.lt.s32.totalorder %s932_s14, %s928_s5 }
 0x196   :  { %p935_p0 = por %p934_p13, %p933_p12 }
 0x198   :  { %p936_p1 = pnand %p935_p0, %p929_p11 }
 0x19a   :  { %939 = shalt.err (!%p936_p1)
}
 0x19b   :  { %701 = dma.vmem_to_hbm [thread:$0]  %s1459_s18, 16, %s1530_s7, [#allocation8]  }
 0x19c   :  { %s948_s8 = scalar_lea.vmem %s1461_s20, 16  ;;  %s952_s12 = scalar_lea.vmem %s1461_s20, 32 }
 0x19d   :  { %p949_p2 = scmp.ne.s32.totalorder %s1461_s20, %s948_s8  ;;  %p953_p3 = scmp.lt.s32.totalorder %s1461_s20, %s1461_s20 }
 0x19e   :  { %p954_p4 = scmp.lt.s32.totalorder %s952_s12, %s948_s8 }
 0x1a0   :  { %p955_p5 = por %p954_p4, %p953_p3 }
 0x1a2   :  { %p956_p6 = pnand %p955_p5, %p949_p2 }
 0x1a4   :  { %959 = shalt.err (!%p956_p6)
}
 0x1a5   :  { %721 = dma.vmem_to_hbm [thread:$0]  %s1461_s20, 16, %s1532_s9, [#allocation11]  }
 0x1a6   :  { %s968_s21 = scalar_lea.vmem %s1463_s22, 16  ;;  %s972_s7 = scalar_lea.vmem %s1463_s22, 32 }
 0x1a7   :  { %p969_p7 = scmp.ne.s32.totalorder %s1463_s22, %s968_s21  ;;  %p973_p8 = scmp.lt.s32.totalorder %s1463_s22, %s1463_s22 }
 0x1a8   :  { %p974_p9 = scmp.lt.s32.totalorder %s972_s7, %s968_s21 }
 0x1aa   :  { %p975_p10 = por %p974_p9, %p973_p8 }
 0x1ac   :  { %p976_p11 = pnand %p975_p10, %p969_p7 }
 0x1ae   :  { %979 = shalt.err (!%p976_p11)
}
 0x1af   :  { %731 = dma.vmem_to_hbm [thread:$0]  %s1463_s22, 16, %s1533_s10, [#allocation14]  }
 0x1b0   :  { %988 = dma.done.wait [#allocation3], 64  }
 0x1b1   :  { %989 = vsyncadd [#allocation3], 4294967232 }
 0x1b2   :  { %990 = dma.done.wait [#allocation5], 80  }
 0x1b3   :  { %991 = vsyncadd [#allocation5], 4294967216 }
 0x1b4   :  { %992 = dma.done.wait [#allocation8], 32  }
 0x1b5   :  { %993 = vsyncadd [#allocation8], 4294967264 }
 0x1b6   :  { %994 = dma.done.wait [#allocation11], 32  }
 0x1b7   :  { %995 = vsyncadd [#allocation11], 4294967264 }
 0x1b8   :  { %996 = dma.done.wait [#allocation14], 16  }
 0x1b9   :  { %997 = vsyncadd [#allocation14], 4294967280 }
 0x1ba   :  { %756 = vsyncpa [#allocation3], 1 }
 0x1bb   :  { %757 = vsyncpa [#allocation5], 1 }
 0x1bc   :  { %758 = vsyncpa [#allocation8], 1 }
 0x1bd   :  { %759 = vsyncpa [#allocation11], 1 }
 0x1be   :  { %760 = vsyncpa [#allocation14], 1 }

</bundles_post_ra>
